<compile_context>
chip_gen: v7x
topology: tpu7x:2x2x1
jax: 0.10.0
libtpu: 0.0.40
codegen_flags: <defaults>
</compile_context>

<pallas_src>
import functools

import jax
import jax.numpy as jnp
from jax import lax
from jax.experimental import pallas as pl
from jax.experimental.pallas import tpu as pltpu

LN_EPS = 1e-5
BN_EPS = 1e-5

LANE = 128
SUBLANE = 8


def _round_up(v, m):
    return ((v + m - 1) // m) * m


def _conformer_conv_kernel(x_ref, tmask_ref, ln_g_ref, ln_b_ref, w1_ref, b1_ref,
                           dw_ref, dwb_ref, w2_ref, b2_ref, o_ref, *, e_true):
    # x_ref block: (Mblk, Ep) = Bblk padded sequences of Tp rows, lanes = embed.
    x = x_ref[...].astype(jnp.float32)

    # ---- pre-LayerNorm over the true embed lanes (padded lanes are zero) ----
    inv_e = jnp.float32(1.0 / e_true)
    mean = jnp.sum(x, axis=-1, keepdims=True) * inv_e
    var = jnp.maximum(jnp.sum(x * x, axis=-1, keepdims=True) * inv_e
                      - mean * mean, 0.0)
    y = (x - mean) * lax.rsqrt(var + LN_EPS)
    y = y * ln_g_ref[...] + ln_b_ref[...]                     # padded lanes -> 0

    # ---- pointwise Conv1d(E -> 2N, k=1): bf16 MXU matmul, f32 accumulate ----
    z = jnp.dot(y.astype(jnp.bfloat16), w1_ref[...],
                preferred_element_type=jnp.float32) + b1_ref[...]

    # ---- GLU over the channel dim (halves live at [0:Np) and [Np:2Np)) ----
    n_pad = z.shape[1] // 2
    u = z[:, :n_pad] * jax.nn.sigmoid(z[:, n_pad:])           # (Mblk, Np)

    # Zero the padded tail rows of every sequence: they are the SAME zero
    # padding the circular rolls below rotate in at both sequence edges.
    u = u * tmask_ref[...]

    # ---- depthwise Conv1d(K, SAME, groups=N); BatchNorm folded into dw/dwb.
    # Time shifts = XLU sublane rolls (free slot while VPU/MXU are busy).
    dw = dw_ref[...].astype(jnp.float32)                      # (K, Np), load once
    k_size = dw.shape[0]
    pad = (k_size - 1) // 2
    rows = u.shape[0]
    acc = u * dw[pad:pad + 1, :]
    for k in range(k_size):                                   # static unroll
        if k == pad:
            continue
        acc = acc + pltpu.roll(u, shift=(pad - k) % rows, axis=0) * dw[k:k + 1, :]
    v = acc + dwb_ref[...]

    # ---- depthwise activation (SiLU) ----
    s = v * jax.nn.sigmoid(v)

    # ---- pointwise Conv1d(N -> E, k=1): bf16 MXU matmul, f32 accumulate ----
    out = jnp.dot(s.astype(jnp.bfloat16), w2_ref[...],
                  preferred_element_type=jnp.float32) + b2_ref[...]

    # Dropout is identity at inference.
    o_ref[...] = out.astype(o_ref.dtype)


@jax.jit
def conformer_conv_module(x, ln_g, ln_b, w1, b1, dw, dwb, bn_s, bn_sh, w2, b2):
    """x: (B, T, E) float32.  Returns (B, T, E)."""
    B, T, E = x.shape
    K, N = dw.shape
    if K % 2 != 1:
        raise ValueError("kernel_size must be odd for symmetric SAME padding")
    pad = (K - 1) // 2

    Ep = _round_up(E, LANE)
    Np = _round_up(N, LANE)
    # Every padded sequence ends with >= pad zero rows -> depthwise halo.
    Tp = _round_up(T + pad, SUBLANE)
    f32 = jnp.float32

    # ---- host-side parameter prep: BN folding + lane-dense zero padding ----
    dw_f = dw.astype(f32) * bn_s.astype(f32)                        # (K, N)
    dwb_f = dwb.astype(f32) * bn_s.astype(f32) + bn_sh.astype(f32)  # (1, N)

    def pad2(a, r, c):
        a = a.astype(f32)
        return jnp.pad(a, ((0, r - a.shape[0]), (0, c - a.shape[1])))

    ln_g_p = pad2(ln_g, 1, Ep)
    ln_b_p = pad2(ln_b, 1, Ep)
    # Keep the GLU halves at [0:N) and [Np:Np+N) so the kernel splits at Np.
    w1_p = jnp.concatenate([pad2(w1[:, :N], Ep, Np), pad2(w1[:, N:], Ep, Np)],
                           axis=1).astype(jnp.bfloat16)             # (Ep, 2Np)
    b1_p = jnp.concatenate([pad2(b1[:, :N], 1, Np), pad2(b1[:, N:], 1, Np)],
                           axis=1)                                  # (1, 2Np)
    dw_p = pad2(dw_f, K, Np)
    dwb_p = pad2(dwb_f, 1, Np)
    w2_p = pad2(w2, Np, Ep).astype(jnp.bfloat16)                    # (Np, Ep)
    b2_p = pad2(b2, 1, Ep)

    # ---- batch tiling: fold as many sequences per grid step as fit VMEM ----
    def io_bytes(bb):
        rows = bb * Tp
        dbuf = 2 * 2 * rows * Ep * 4            # in + out blocks, double buffered
        mask = 2 * rows * LANE * 4              # tmask block (lane-padded), dbuf
        temps = rows * (2 * Ep + 4 * Np) * 4    # y/z/u/acc/v/s peak estimate
        return dbuf + mask + temps

    budget = 16 * 1024 * 1024
    Bblk = 1
    for bb in range(min(B, 1024), 0, -1):
        if io_bytes(bb) <= budget:
            Bblk = bb
            break
    Bpad = _round_up(B, Bblk)
    Mblk = Bblk * Tp
    grid = (Bpad // Bblk,)

    # x: (B,T,E) -> zero-padded (Bpad,Tp,Ep) -> flat lane-dense row slab.
    x_p = jnp.pad(x, ((0, Bpad - B), (0, Tp - T), (0, Ep - E))).reshape(
        Bpad * Tp, Ep)
    # 1.0 on real time rows, 0.0 on the padded tail rows of each sequence.
    tmask = (jnp.arange(Tp) < T).astype(f32)
    tmask = jnp.broadcast_to(tmask[None, :, None], (Bpad, Tp, 1)).reshape(
        Bpad * Tp, 1)

    wt_bytes = 2 * (w1_p.size + w2_p.size) + 4 * (
        b1_p.size + b2_p.size + dw_p.size + dwb_p.size + ln_g_p.size + ln_b_p.size)
    vmem_limit = int(min(64 * 1024 * 1024,
                         max(32 * 1024 * 1024, 2 * (io_bytes(Bblk) + wt_bytes))))

    full = lambda shape: pl.BlockSpec(shape, lambda i: (0, 0))
    out = pl.pallas_call(
        functools.partial(_conformer_conv_kernel, e_true=E),
        out_shape=jax.ShapeDtypeStruct((Bpad * Tp, Ep), x.dtype),
        grid=grid,
        in_specs=[
            pl.BlockSpec((Mblk, Ep), lambda i: (i, 0)),   # x rows
            pl.BlockSpec((Mblk, 1), lambda i: (i, 0)),    # time-validity mask
            full((1, Ep)), full((1, Ep)),                 # LN gamma / beta
            full((Ep, 2 * Np)), full((1, 2 * Np)),        # pointwise conv1 (bf16 W)
            full((K, Np)), full((1, Np)),                 # depthwise (BN folded)
            full((Np, Ep)), full((1, Ep)),                # pointwise conv2 (bf16 W)
        ],
        out_specs=pl.BlockSpec((Mblk, Ep), lambda i: (i, 0)),
        compiler_params=pltpu.CompilerParams(
            dimension_semantics=("parallel",),
            vmem_limit_bytes=vmem_limit),
    )(x_p, tmask, ln_g_p, ln_b_p, w1_p, b1_p, dw_p, dwb_p, w2_p, b2_p)

    return out.reshape(Bpad, Tp, Ep)[:B, :T, :E]


def _reference(x, ln_g, ln_b, w1, b1, dw, dwb, bn_s, bn_sh, w2, b2):
    """Plain-JAX (f32) reference of the same math for validation."""
    B, T, E = x.shape
    K, N = dw.shape
    mean = jnp.mean(x, axis=-1, keepdims=True)
    var = jnp.mean((x - mean) ** 2, axis=-1, keepdims=True)
    y = (x - mean) / jnp.sqrt(var + LN_EPS) * ln_g + ln_b
    z = jnp.einsum("bte,ec->btc", y, w1) + b1
    u = z[..., :N] * jax.nn.sigmoid(z[..., N:])
    pad = (K - 1) // 2
    upad = jnp.pad(u, ((0, 0), (pad, pad), (0, 0)))
    v = sum(upad[:, k:k + T, :] * dw[k][None, None, :] for k in range(K)) + dwb
    w = v * bn_s + bn_sh
    s = w * jax.nn.sigmoid(w)
    return jnp.einsum("btn,ne->bte", s, w2) + b2


if __name__ == "__main__":
    # Small synthetic shapes consistent with the module.
    B, T = 2, 16
    embed_dim = 32          # E
    n_channels = 32         # N
    kernel_size = 3         # odd -> SAME padding

    key = jax.random.PRNGKey(0)
    ks = jax.random.split(key, 12)

    x = jax.random.normal(ks[0], (B, T, embed_dim), jnp.float32)

    # LayerNorm affine params.
    ln_g = 1.0 + 0.1 * jax.random.normal(ks[1], (1, embed_dim), jnp.float32)
    ln_b = 0.1 * jax.random.normal(ks[2], (1, embed_dim), jnp.float32)

    # Pointwise conv1: PyTorch weight (2N, E, 1) -> matmul weight (E, 2N).
    w1 = 0.1 * jax.random.normal(ks[3], (embed_dim, 2 * n_channels), jnp.float32)
    b1 = 0.1 * jax.random.normal(ks[4], (1, 2 * n_channels), jnp.float32)

    # Depthwise conv: PyTorch weight (N, 1, K) -> (K, N).
    dw = 0.1 * jax.random.normal(ks[5], (kernel_size, n_channels), jnp.float32)
    dwb = 0.1 * jax.random.normal(ks[6], (1, n_channels), jnp.float32)

    # BatchNorm1d params + running stats (inference), folded on the host.
    bn_gamma = 1.0 + 0.1 * jax.random.normal(ks[7], (1, n_channels), jnp.float32)
    bn_beta = 0.1 * jax.random.normal(ks[8], (1, n_channels), jnp.float32)
    bn_rmean = 0.1 * jax.random.normal(ks[9], (1, n_channels), jnp.float32)
    bn_rvar = jax.random.uniform(ks[10], (1, n_channels), jnp.float32, 0.5, 1.5)
    bn_s = bn_gamma / jnp.sqrt(bn_rvar + BN_EPS)
    bn_sh = bn_beta - bn_rmean * bn_s

    # Pointwise conv2: PyTorch weight (E, N, 1) -> matmul weight (N, E).
    w2 = 0.1 * jax.random.normal(ks[11], (n_channels, embed_dim), jnp.float32)
    b2 = 0.1 * jax.random.normal(jax.random.fold_in(key, 99), (1, embed_dim),
                                 jnp.float32)

    out = conformer_conv_module(x, ln_g, ln_b, w1, b1, dw, dwb, bn_s, bn_sh, w2, b2)
    out = jax.block_until_ready(out)

    ref = _reference(x, ln_g, ln_b, w1, b1, dw, dwb, bn_s, bn_sh, w2, b2)
    assert out.shape == (B, T, embed_dim), out.shape
    # bf16 MXU operands (f32 accumulation) -> slightly looser tolerance.
    assert jnp.allclose(out, ref, atol=1e-2, rtol=1e-2), \
        float(jnp.max(jnp.abs(out - ref)))

    print("KERNEL_OK")
</pallas_src>

<mosaic_0001>
module attributes {stable_mosaic.version = 11 : i64} {
  func.func @_conformer_conv_kernel(%arg0: i32, %arg1: memref<48x128xf32, #tpu.memory_space<vmem>>, %arg2: memref<48x1xf32, #tpu.memory_space<vmem>>, %arg3: memref<1x128xf32, #tpu.memory_space<vmem>>, %arg4: memref<1x128xf32, #tpu.memory_space<vmem>>, %arg5: memref<128x256xbf16, #tpu.memory_space<vmem>>, %arg6: memref<1x256xf32, #tpu.memory_space<vmem>>, %arg7: memref<3x128xf32, #tpu.memory_space<vmem>>, %arg8: memref<1x128xf32, #tpu.memory_space<vmem>>, %arg9: memref<128x128xbf16, #tpu.memory_space<vmem>>, %arg10: memref<1x128xf32, #tpu.memory_space<vmem>>, %arg11: memref<48x128xf32, #tpu.memory_space<vmem>>) attributes {dimension_semantics = [#tpu.dimension_semantics<parallel>], iteration_bounds = array<i64: 1>, scalar_prefetch = 0 : i64, scratch_operands = 0 : i64, tpu.core_type = #tpu.core_type<tc>, window_params = [{transform_indices = @transform_0, window_bounds = array<i64: 48, 128>}, {transform_indices = @transform_1, window_bounds = array<i64: 48, 1>}, {pipeline_mode = #tpu.pipeline_mode<synchronous>, transform_indices = @transform_2, window_bounds = array<i64: 1, 128>}, {pipeline_mode = #tpu.pipeline_mode<synchronous>, transform_indices = @transform_3, window_bounds = array<i64: 1, 128>}, {pipeline_mode = #tpu.pipeline_mode<synchronous>, transform_indices = @transform_4, window_bounds = array<i64: 128, 256>}, {pipeline_mode = #tpu.pipeline_mode<synchronous>, transform_indices = @transform_5, window_bounds = array<i64: 1, 256>}, {pipeline_mode = #tpu.pipeline_mode<synchronous>, transform_indices = @transform_6, window_bounds = array<i64: 3, 128>}, {pipeline_mode = #tpu.pipeline_mode<synchronous>, transform_indices = @transform_7, window_bounds = array<i64: 1, 128>}, {pipeline_mode = #tpu.pipeline_mode<synchronous>, transform_indices = @transform_8, window_bounds = array<i64: 128, 128>}, {pipeline_mode = #tpu.pipeline_mode<synchronous>, transform_indices = @transform_9, window_bounds = array<i64: 1, 128>}, {transform_indices = @transform_10, window_bounds = array<i64: 48, 128>}]} {
    %c0 = arith.constant 0 : index
    %c0_0 = arith.constant 0 : index
    %0 = vector.load %arg1[%c0, %c0_0] : memref<48x128xf32, #tpu.memory_space<vmem>>, vector<48x128xf32>
    %cst = arith.constant dense<0.000000e+00> : vector<48xf32>
    %1 = vector.multi_reduction <add>, %0, %cst [1] : vector<48x128xf32> to vector<48xf32>
    %2 = vector.shape_cast %1 : vector<48xf32> to vector<48x1xf32>
    %cst_1 = arith.constant 3.125000e-02 : f32
    %3 = vector.broadcast %cst_1 : f32 to vector<48x1xf32>
    %4 = arith.mulf %2, %3 : vector<48x1xf32>
    %5 = arith.mulf %0, %0 : vector<48x128xf32>
    %cst_2 = arith.constant dense<0.000000e+00> : vector<48xf32>
    %6 = vector.multi_reduction <add>, %5, %cst_2 [1] : vector<48x128xf32> to vector<48xf32>
    %7 = vector.shape_cast %6 : vector<48xf32> to vector<48x1xf32>
    %cst_3 = arith.constant 3.125000e-02 : f32
    %8 = vector.broadcast %cst_3 : f32 to vector<48x1xf32>
    %9 = arith.mulf %7, %8 : vector<48x1xf32>
    %10 = arith.mulf %4, %4 : vector<48x1xf32>
    %11 = arith.subf %9, %10 : vector<48x1xf32>
    %cst_4 = arith.constant 0.000000e+00 : f32
    %12 = vector.broadcast %cst_4 : f32 to vector<48x1xf32>
    %13 = arith.maximumf %11, %12 : vector<48x1xf32>
    %14 = vector.broadcast %4 : vector<48x1xf32> to vector<48x128xf32>
    %15 = arith.subf %0, %14 : vector<48x128xf32>
    %cst_5 = arith.constant 9.99999974E-6 : f32
    %16 = vector.broadcast %cst_5 : f32 to vector<48x1xf32>
    %17 = arith.addf %13, %16 : vector<48x1xf32>
    %18 = math.rsqrt %17 : vector<48x1xf32>
    %19 = vector.broadcast %18 : vector<48x1xf32> to vector<48x128xf32>
    %20 = arith.mulf %15, %19 : vector<48x128xf32>
    %c0_6 = arith.constant 0 : index
    %c0_7 = arith.constant 0 : index
    %21 = vector.load %arg3[%c0_6, %c0_7] : memref<1x128xf32, #tpu.memory_space<vmem>>, vector<1x128xf32>
    %22 = vector.broadcast %21 : vector<1x128xf32> to vector<48x128xf32>
    %23 = arith.mulf %20, %22 : vector<48x128xf32>
    %c0_8 = arith.constant 0 : index
    %c0_9 = arith.constant 0 : index
    %24 = vector.load %arg4[%c0_8, %c0_9] : memref<1x128xf32, #tpu.memory_space<vmem>>, vector<1x128xf32>
    %25 = vector.broadcast %24 : vector<1x128xf32> to vector<48x128xf32>
    %26 = arith.addf %23, %25 : vector<48x128xf32>
    %27 = arith.truncf %26 : vector<48x128xf32> to vector<48x128xbf16>
    %c0_10 = arith.constant 0 : index
    %c0_11 = arith.constant 0 : index
    %28 = vector.load %arg5[%c0_10, %c0_11] : memref<128x256xbf16, #tpu.memory_space<vmem>>, vector<128x256xbf16>
    %cst_12 = arith.constant dense<0.000000e+00> : vector<48x256xf32>
    %29 = tpu.matmul %27, %28, %cst_12 {dimension_numbers = #tpu.dot_dimension_numbers<[1], [0], [0], [1], [0, 0, 1, 1], [], []>} : vector<48x128xbf16>, vector<128x256xbf16>, vector<48x256xf32> -> vector<48x256xf32>
    %c0_13 = arith.constant 0 : index
    %c0_14 = arith.constant 0 : index
    %30 = vector.load %arg6[%c0_13, %c0_14] : memref<1x256xf32, #tpu.memory_space<vmem>>, vector<1x256xf32>
    %31 = vector.broadcast %30 : vector<1x256xf32> to vector<48x256xf32>
    %32 = arith.addf %29, %31 : vector<48x256xf32>
    %33 = vector.extract_strided_slice %32 {offsets = [0, 0], sizes = [48, 128], strides = [1, 1]} : vector<48x256xf32> to vector<48x128xf32>
    %34 = vector.extract_strided_slice %32 {offsets = [0, 128], sizes = [48, 128], strides = [1, 1]} : vector<48x256xf32> to vector<48x128xf32>
    %35 = arith.negf %34 : vector<48x128xf32>
    %36 = math.exp %35 : vector<48x128xf32>
    %cst_15 = arith.constant 1.000000e+00 : f32
    %37 = vector.broadcast %cst_15 : f32 to vector<48x128xf32>
    %38 = arith.addf %37, %36 : vector<48x128xf32>
    %39 = arith.divf %37, %38 : vector<48x128xf32>
    %40 = arith.mulf %33, %39 : vector<48x128xf32>
    %c0_16 = arith.constant 0 : index
    %c0_17 = arith.constant 0 : index
    %41 = vector.load %arg2[%c0_16, %c0_17] : memref<48x1xf32, #tpu.memory_space<vmem>>, vector<48x1xf32>
    %42 = vector.broadcast %41 : vector<48x1xf32> to vector<48x128xf32>
    %43 = arith.mulf %40, %42 : vector<48x128xf32>
    %c0_18 = arith.constant 0 : index
    %c0_19 = arith.constant 0 : index
    %44 = vector.load %arg7[%c0_18, %c0_19] : memref<3x128xf32, #tpu.memory_space<vmem>>, vector<3x128xf32>
    %45 = vector.extract_strided_slice %44 {offsets = [1, 0], sizes = [1, 128], strides = [1, 1]} : vector<3x128xf32> to vector<1x128xf32>
    %46 = vector.broadcast %45 : vector<1x128xf32> to vector<48x128xf32>
    %47 = arith.mulf %43, %46 : vector<48x128xf32>
    %c1_i32 = arith.constant 1 : i32
    %48 = tpu.dynamic_rotate %43 by %c1_i32 dim 0 : vector<48x128xf32>, i32 -> vector<48x128xf32>
    %49 = vector.extract_strided_slice %44 {offsets = [0, 0], sizes = [1, 128], strides = [1, 1]} : vector<3x128xf32> to vector<1x128xf32>
    %50 = vector.broadcast %49 : vector<1x128xf32> to vector<48x128xf32>
    %51 = arith.mulf %48, %50 : vector<48x128xf32>
    %52 = arith.addf %47, %51 : vector<48x128xf32>
    %c47_i32 = arith.constant 47 : i32
    %53 = tpu.dynamic_rotate %43 by %c47_i32 dim 0 : vector<48x128xf32>, i32 -> vector<48x128xf32>
    %54 = vector.extract_strided_slice %44 {offsets = [2, 0], sizes = [1, 128], strides = [1, 1]} : vector<3x128xf32> to vector<1x128xf32>
    %55 = vector.broadcast %54 : vector<1x128xf32> to vector<48x128xf32>
    %56 = arith.mulf %53, %55 : vector<48x128xf32>
    %57 = arith.addf %52, %56 : vector<48x128xf32>
    %c0_20 = arith.constant 0 : index
    %c0_21 = arith.constant 0 : index
    %58 = vector.load %arg8[%c0_20, %c0_21] : memref<1x128xf32, #tpu.memory_space<vmem>>, vector<1x128xf32>
    %59 = vector.broadcast %58 : vector<1x128xf32> to vector<48x128xf32>
    %60 = arith.addf %57, %59 : vector<48x128xf32>
    %61 = arith.negf %60 : vector<48x128xf32>
    %62 = math.exp %61 : vector<48x128xf32>
    %cst_22 = arith.constant 1.000000e+00 : f32
    %63 = vector.broadcast %cst_22 : f32 to vector<48x128xf32>
    %64 = arith.addf %63, %62 : vector<48x128xf32>
    %65 = arith.divf %63, %64 : vector<48x128xf32>
    %66 = arith.mulf %60, %65 : vector<48x128xf32>
    %67 = arith.truncf %66 : vector<48x128xf32> to vector<48x128xbf16>
    %c0_23 = arith.constant 0 : index
    %c0_24 = arith.constant 0 : index
    %68 = vector.load %arg9[%c0_23, %c0_24] : memref<128x128xbf16, #tpu.memory_space<vmem>>, vector<128x128xbf16>
    %cst_25 = arith.constant dense<0.000000e+00> : vector<48x128xf32>
    %69 = tpu.matmul %67, %68, %cst_25 {dimension_numbers = #tpu.dot_dimension_numbers<[1], [0], [0], [1], [0, 0, 1, 1], [], []>} : vector<48x128xbf16>, vector<128x128xbf16>, vector<48x128xf32> -> vector<48x128xf32>
    %c0_26 = arith.constant 0 : index
    %c0_27 = arith.constant 0 : index
    %70 = vector.load %arg10[%c0_26, %c0_27] : memref<1x128xf32, #tpu.memory_space<vmem>>, vector<1x128xf32>
    %71 = vector.broadcast %70 : vector<1x128xf32> to vector<48x128xf32>
    %72 = arith.addf %69, %71 : vector<48x128xf32>
    %c0_28 = arith.constant 0 : index
    %c0_29 = arith.constant 0 : index
    %73 = vector.load %arg11[%c0_28, %c0_29] : memref<48x128xf32, #tpu.memory_space<vmem>>, vector<48x128xf32>
    tpu.vector_store %arg11[%c0_28, %c0_29], %72 {strides = array<i32>} : memref<48x128xf32, #tpu.memory_space<vmem>>, vector<48x128xf32>,
    return
  }
  func.func @transform_0(%arg0: i32) -> (i32, i32) {
    %c0_i32 = arith.constant 0 : i32
    %c0_i32_0 = arith.constant 0 : i32
    return %arg0, %c0_i32 : i32, i32
  }
  func.func @transform_1(%arg0: i32) -> (i32, i32) {
    %c0_i32 = arith.constant 0 : i32
    %c0_i32_0 = arith.constant 0 : i32
    return %arg0, %c0_i32 : i32, i32
  }
  func.func @transform_2(%arg0: i32) -> (i32, i32) {
    %c0_i32 = arith.constant 0 : i32
    %c0_i32_0 = arith.constant 0 : i32
    %c0_i32_1 = arith.constant 0 : i32
    return %c0_i32, %c0_i32_0 : i32, i32
  }
  func.func @transform_3(%arg0: i32) -> (i32, i32) {
    %c0_i32 = arith.constant 0 : i32
    %c0_i32_0 = arith.constant 0 : i32
    %c0_i32_1 = arith.constant 0 : i32
    return %c0_i32, %c0_i32_0 : i32, i32
  }
  func.func @transform_4(%arg0: i32) -> (i32, i32) {
    %c0_i32 = arith.constant 0 : i32
    %c0_i32_0 = arith.constant 0 : i32
    %c0_i32_1 = arith.constant 0 : i32
    return %c0_i32, %c0_i32_0 : i32, i32
  }
  func.func @transform_5(%arg0: i32) -> (i32, i32) {
    %c0_i32 = arith.constant 0 : i32
    %c0_i32_0 = arith.constant 0 : i32
    %c0_i32_1 = arith.constant 0 : i32
    return %c0_i32, %c0_i32_0 : i32, i32
  }
  func.func @transform_6(%arg0: i32) -> (i32, i32) {
    %c0_i32 = arith.constant 0 : i32
    %c0_i32_0 = arith.constant 0 : i32
    %c0_i32_1 = arith.constant 0 : i32
    return %c0_i32, %c0_i32_0 : i32, i32
  }
  func.func @transform_7(%arg0: i32) -> (i32, i32) {
    %c0_i32 = arith.constant 0 : i32
    %c0_i32_0 = arith.constant 0 : i32
    %c0_i32_1 = arith.constant 0 : i32
    return %c0_i32, %c0_i32_0 : i32, i32
  }
  func.func @transform_8(%arg0: i32) -> (i32, i32) {
    %c0_i32 = arith.constant 0 : i32
    %c0_i32_0 = arith.constant 0 : i32
    %c0_i32_1 = arith.constant 0 : i32
    return %c0_i32, %c0_i32_0 : i32, i32
  }
  func.func @transform_9(%arg0: i32) -> (i32, i32) {
    %c0_i32 = arith.constant 0 : i32
    %c0_i32_0 = arith.constant 0 : i32
    %c0_i32_1 = arith.constant 0 : i32
    return %c0_i32, %c0_i32_0 : i32, i32
  }
  func.func @transform_10(%arg0: i32) -> (i32, i32) {
    %c0_i32 = arith.constant 0 : i32
    %c0_i32_0 = arith.constant 0 : i32
    return %arg0, %c0_i32 : i32, i32
  }
}

</mosaic_0001>

<bundles_post_ra>
// kernel: conformer_conv_module.1
= control target key start
LH: loop header
LB: loop body
LE: loop exit
PB: predicated region body
PF: predicated region fallthrough
CT: control target
= control target key end

     0   :  { %v853_v28 = vmov 0   ;;  %vm855_vm0 = vmmov 0   ;;  %s1174_s0 = inlined_call_operand.vmem [shape: f32[48,128], index: 0, kind: input, shape index: {}]   ;;  %s1175_s4 = inlined_call_operand.vmem [shape: bf16[128,256], index: 4, kind: input, shape index: {}]   ;;  %s1176_s1 = inlined_call_operand.vmem [shape: f32[48,1], index: 1, kind: input, shape index: {}]   ;;  %s1177_s2 = inlined_call_operand.vmem [shape: f32[1,128], index: 2, kind: input, shape index: {}]   ;;  %s1178_s3 = inlined_call_operand.vmem [shape: f32[1,128], index: 3, kind: input, shape index: {}]   ;;  %s1179_s8 = inlined_call_operand.vmem [shape: bf16[128,128], index: 8, kind: input, shape index: {}]   ;;  %s1180_s5 = inlined_call_operand.vmem [shape: f32[1,256], index: 5, kind: input, shape index: {}]   ;;  %s1181_s6 = inlined_call_operand.vmem [shape: f32[3,128], index: 6, kind: input, shape index: {}]   ;;  %s1182_s7 = inlined_call_operand.vmem [shape: f32[1,128], index: 7, kind: input, shape index: {}]   ;;  %s1183_s9 = inlined_call_operand.vmem [shape: f32[1,128], index: 9, kind: input, shape index: {}]   ;;  %s1184_s10 = inlined_call_operand.vmem [shape: f32[48,128], index: 10, kind: output, shape index: {}]  }
   0x1   :  { %v914_v0 = vld [vmem:[%s1174_s0] sm:$0xff]  ;;  %v919_v1 = vld [vmem:[%s1174_s0 + $0x8] sm:$0xff]  ;;  %v930_v4 = vld [vmem:[%s1174_s0 + $0x10] sm:$0xff]  ;;  %295 = vmatprep.mubr.bf16.mxu0 %v853_v28  ;;  %760 = vset.pattern.permute.xlu1 %v853_v28 }
   0x2   :  { %42 = vadd.xlane.f32.xlu0 %v914_v0  ;;  %v60_v2 = vmul.f32 %v914_v0, %v914_v0  ;;  %v61_v3 = vmul.f32 %v919_v1, %v919_v1  ;;  %v935_v5 = vld [vmem:[%s1174_s0 + $0x18] sm:$0xff]  ;;  %v62_v6 = vmul.f32 %v930_v4, %v930_v4  ;;  %v946_v8 = vld [vmem:[%s1174_s0 + $0x20] sm:$0xff]  ;;  %v951_v9 = vld [vmem:[%s1174_s0 + $0x28] sm:$0xff] }
   0x3   :  { %v63_v7 = vmul.f32 %v935_v5, %v935_v5  ;;  %v761_v10 = vld [vmem:[%s1175_s4 + $0x4] ss:$8 sps:$4 sm:$0xff]   ;;  %v763_v11 = vld [vmem:[%s1175_s4] ss:$8 sps:$4 sm:$0xff]   ;;  %v64_v12 = vmul.f32 %v946_v8, %v946_v8  ;;  %v764_v13 = vld [vmem:[%s1175_s4 + $0x14] ss:$8 sps:$4 sm:$0xff]   ;;  %v65_v14 = vmul.f32 %v951_v9, %v951_v9  ;;  %759 = vset.pattern.permute.xlu0 %v853_v28 }
   0x4   :  { %66 = vadd.xlane.f32.xlu1 %v60_v2  ;;  %263 = vmatprep.subr.bf16.mxu0 %v761_v10  ;;  %v766_v15 = vld [vmem:[%s1175_s4 + $0x10] ss:$8 sps:$4 sm:$0xff]   ;;  %v767_v16 = vld [vmem:[%s1175_s4 + $0x24] ss:$8 sps:$4 sm:$0xff]   ;;  %v769_v17 = vld [vmem:[%s1175_s4 + $0x20] ss:$8 sps:$4 sm:$0xff]  }
   0x5   :  { %264 = vmatpush1.bf16.msra.mxu0 %v763_v11  ;;  %v770_v18 = vld [vmem:[%s1175_s4 + $0x34] ss:$8 sps:$4 sm:$0xff]   ;;  %v772_v19 = vld [vmem:[%s1175_s4 + $0x30] ss:$8 sps:$4 sm:$0xff]   ;;  %v773_v20 = vld [vmem:[%s1175_s4 + $0x44] ss:$8 sps:$4 sm:$0xff]  }
   0x6   :  { %44 = vadd.xlane.f32.xlu0 %v919_v1  ;;  %265 = vmatprep.subr.bf16.mxu0 %v764_v13  ;;  %v775_v21 = vld [vmem:[%s1175_s4 + $0x40] ss:$8 sps:$4 sm:$0xff]   ;;  %v776_v22 = vld [vmem:[%s1175_s4 + $0x54] ss:$8 sps:$4 sm:$0xff]   ;;  %v778_v23 = vld [vmem:[%s1175_s4 + $0x50] ss:$8 sps:$4 sm:$0xff]  }
   0x7   :  { %v779_v24 = vld [vmem:[%s1175_s4 + $0x64] ss:$8 sps:$4 sm:$0xff]   ;;  %v781_v25 = vld [vmem:[%s1175_s4 + $0x60] ss:$8 sps:$4 sm:$0xff]   ;;  %v782_v26 = vld [vmem:[%s1175_s4 + $0x74] ss:$8 sps:$4 sm:$0xff]  }
   0x8   :  { %68 = vadd.xlane.f32.xlu1 %v61_v3  ;;  %v784_v27 = vld [vmem:[%s1175_s4 + $0x70] ss:$8 sps:$4 sm:$0xff]   ;;  %v369_v29 = vld [vmem:[%s1176_s1 + $0x8] sm:$0xff]  ;;  %v368_v30 = vld [vmem:[%s1176_s1] sm:$0xff] }
   0x9   :  { %266 = vmatpush1.bf16.msra.mxu0 %v766_v15  ;;  %v373_v31 = vld [vmem:[%s1176_s1 + $0x28] sm:$0xff]  ;;  %v370_v32 = vld [vmem:[%s1176_s1 + $0x10] sm:$0xff]  ;;  %v371_v33 = vld [vmem:[%s1176_s1 + $0x18] sm:$0xff] }
   0xa   :  { %46 = vadd.xlane.f32.xlu0 %v930_v4  ;;  %267 = vmatprep.subr.bf16.mxu0 %v767_v16  ;;  %v372_v34 = vld [vmem:[%s1176_s1 + $0x20] sm:$0xff] }
   0xc   :  { %48 = vadd.xlane.f32.xlu1 %v935_v5 }
   0xd   :  { %268 = vmatpush1.bf16.msra.mxu0 %v769_v17 }
   0xe   :  { %70 = vadd.xlane.f32.xlu0 %v62_v6  ;;  %269 = vmatprep.subr.bf16.mxu0 %v770_v18 }
  0x10   :  { %72 = vadd.xlane.f32.xlu1 %v63_v7 }
  0x11   :  { %270 = vmatpush1.bf16.msra.mxu0 %v772_v19 }
  0x12   :  { %50 = vadd.xlane.f32.xlu0 %v946_v8  ;;  %271 = vmatprep.subr.bf16.mxu0 %v773_v20 }
  0x14   :  { %52 = vadd.xlane.f32.xlu1 %v951_v9 }
  0x15   :  { %272 = vmatpush1.bf16.msra.mxu0 %v775_v21 }
  0x16   :  { %74 = vadd.xlane.f32.xlu0 %v64_v12  ;;  %273 = vmatprep.subr.bf16.mxu0 %v776_v22 }
  0x18   :  { %76 = vadd.xlane.f32.xlu1 %v65_v14 }
  0x19   :  { %274 = vmatpush1.bf16.msra.mxu0 %v778_v23  ;;  %v677_v23 = vld [vmem:[%s1177_s2] ss:$0 sm:$0xff] }
  0x1a   :  { %275 = vmatprep.subr.bf16.mxu0 %v779_v24 }
  0x1d   :  { %276 = vmatpush1.bf16.msra.mxu0 %v781_v25 }
  0x1e   :  { %277 = vmatprep.subr.bf16.mxu0 %v782_v26 }
  0x21   :  { %278 = vmatpush1.bf16.msra.mxu0 %v784_v27 }
  0x29   :  { %381 = vperm.xlu1 %760, %v369_v29  }
  0x2c   :  { %376 = vperm.xlu0 %759, %v368_v30  }
  0x2d   :  { %401 = vperm.xlu1 %760, %v373_v31  }
  0x31   :  { %386 = vperm.xlu1 %760, %v370_v32   ;;  %v678_v32 = vld [vmem:[%s1178_s3] ss:$0 sm:$0xff] }
  0x35   :  { %391 = vperm.xlu1 %760, %v371_v33  }
  0x39   :  { %396 = vperm.xlu1 %760, %v372_v34  }
  0x8f   :  { %v43_v35 = vpop.xlane.xlu0 %42 }
  0x90   :  { %v54_v36 = vmul.f32 0.03125, %v43_v35 }
  0x91   :  { %v67_v37 = vpop.xlane.xlu1 %66 }
  0x92   :  { %v84_v38 = vmul.f32 %v54_v36, %v54_v36  ;;  %v78_v39 = vmul.f32 0.03125, %v67_v37  ;;  %v102_v12 = vsub.f32 %v914_v0, %v54_v36 }
  0x93   :  { %v45_v40 = vpop.xlane.xlu0 %44 }
  0x94   :  { %v90_v41 = vsub.f32 %v78_v39, %v84_v38  ;;  %v55_v42 = vmul.f32 0.03125, %v45_v40 }
  0x95   :  { %v69_v43 = vpop.xlane.xlu1 %68 }
  0x96   :  { %v96_v44 = vmax.f32 %v90_v41, 0.0  ;;  %v85_v45 = vmul.f32 %v55_v42, %v55_v42  ;;  %v79_v46 = vmul.f32 0.03125, %v69_v43  ;;  %v103_v24 = vsub.f32 %v919_v1, %v55_v42 }
  0x97   :  { %v47_v47 = vpop.xlane.xlu0 %46 }
  0x98   :  { %v108_v48 = vadd.f32 1e-05, %v96_v44  ;;  %v91_v49 = vsub.f32 %v79_v46, %v85_v45  ;;  %v56_v50 = vmul.f32 0.03125, %v47_v47 }
  0x99   :  { %v49_v51 = vpop.xlane.xlu1 %48 }
  0x9a   :  { %793 = vrsqrt.f32 %v108_v48  ;;  %v97_v52 = vmax.f32 %v91_v49, 0.0  ;;  %v86_v53 = vmul.f32 %v56_v50, %v56_v50  ;;  %v57_v54 = vmul.f32 0.03125, %v49_v51 }
  0x9b   :  { %v71_v55 = vpop.xlane.xlu0 %70  ;;  %v104_v35 = vsub.f32 %v930_v4, %v56_v50 }
  0x9c   :  { %v109_v56 = vadd.f32 1e-05, %v97_v52  ;;  %v80_v57 = vmul.f32 0.03125, %v71_v55  ;;  %v87_v59 = vmul.f32 %v57_v54, %v57_v54  ;;  %v105_v1 = vsub.f32 %v935_v5, %v57_v54 }
  0x9d   :  { %v73_v58 = vpop.xlane.xlu1 %72 }
  0x9e   :  { %795 = vrsqrt.f32 %v109_v56  ;;  %v92_v60 = vsub.f32 %v80_v57, %v86_v53  ;;  %v81_v61 = vmul.f32 0.03125, %v73_v58  ;;  %v854_v57 = vmov 0.0   ;;  %v788_v58 = vld [vmem:[%s1179_s8 + $0x18] sm:$0xff]  }
  0x9f   :  { %v51_v62 = vpop.xlane.xlu0 %50  ;;  %728 = vmatprep.subr.bf16.mxu1 %v854_v57  ;;  %744 = vmatprep.mubr.msk.bf16.mxu1 %vm855_vm0, %v854_v57 }
  0xa0   :  { %v98_v63 = vmax.f32 %v92_v60, 0.0  ;;  %v93_v2 = vsub.f32 %v81_v61, %v87_v59  ;;  %v58_v3 = vmul.f32 0.03125, %v51_v62  ;;  %v789_v59 = vld [vmem:[%s1179_s8 + $0x20] sm:$0xff]   ;;  %v790_v60 = vld [vmem:[%s1179_s8 + $0x28] sm:$0xff]   ;;  %v791_v61 = vld [vmem:[%s1179_s8 + $0x30] sm:$0xff]  }
  0xa1   :  { %v53_v6 = vpop.xlane.xlu1 %52  ;;  %v792_v62 = vld [vmem:[%s1179_s8 + $0x38] sm:$0xff]  }
  0xa2   :  { %v110_v7 = vadd.f32 1e-05, %v98_v63  ;;  %v99_v10 = vmax.f32 %v93_v2, 0.0  ;;  %v88_v11 = vmul.f32 %v58_v3, %v58_v3  ;;  %v59_v13 = vmul.f32 0.03125, %v53_v6  ;;  %v171_v6 = vld [vmem:[%s1180_s5] sm:$0x3] }
  0xa3   :  { %v75_v14 = vpop.xlane.xlu0 %74  ;;  %v106_v45 = vsub.f32 %v946_v8, %v58_v3  ;;  %v785_v8 = vld [vmem:[%s1179_s8] sm:$0xff]   ;;  %v173_v63 = vlaneseq }
  0xa4   :  { %v794_v15 = vpop.eup %793  ;;  %797 = vrsqrt.f32 %v110_v7  ;;  %v111_v16 = vadd.f32 1e-05, %v99_v10  ;;  %v82_v17 = vmul.f32 0.03125, %v75_v14  ;;  %v89_v20 = vmul.f32 %v59_v13, %v59_v13  ;;  %729 = vmatpush3.bf16.msra.mxu1 %v785_v8 }
  0xa5   :  { %v77_v18 = vpop.xlane.xlu1 %76  ;;  %v120_v19 = vmul.f32 %v794_v15, %v102_v12  ;;  %v107_v48 = vsub.f32 %v951_v9, %v59_v13  ;;  %v786_v9 = vld [vmem:[%s1179_s8 + $0x8] sm:$0xff]   ;;  %730 = vmatprep.subr.bf16.mxu1 %v854_v57  ;;  %v1076_v2 = vshrl.u32 %v173_v63, 7 }
  0xa6   :  { %799 = vrsqrt.f32 %v111_v16  ;;  %v94_v21 = vsub.f32 %v82_v17, %v88_v11  ;;  %v83_v22 = vmul.f32 0.03125, %v77_v18 }
  0xa7   :  { %v133_v29 = vmul.f32 %v677_v23, %v120_v19  ;;  %v179_v3 = vsub.s32 1, %v1076_v2  ;;  %vm429_vm1 = vcmp.lt.s32.totalorder %v1076_v2, 1  ;;  %vm458_vm2 = vcmp.lt.s32.totalorder %v1076_v2, 7 }
  0xa8   :  { %v796_v25 = vpop.eup %795  ;;  %v100_v0 = vmax.f32 %v94_v21, 0.0  ;;  %v95_v26 = vsub.f32 %v83_v22, %v89_v20  ;;  %731 = vmatpush3.bf16.msra.mxu1 %v786_v9 }
  0xa9   :  { %v121_v27 = vmul.f32 %v796_v25, %v103_v24  ;;  %v146_v36 = vadd.f32 %v678_v32, %v133_v29  ;;  %732 = vmatprep.subr.bf16.mxu1 %v854_v57  ;;  %v180_v7 = vrot.slane %v171_v6, %v179_v3 }
  0xaa   :  { %v112_v30 = vadd.f32 1e-05, %v100_v0  ;;  %v101_v31 = vmax.f32 %v95_v26, 0.0 }
  0xab   :  { %v134_v33 = vmul.f32 %v677_v23, %v121_v27 }
  0xac   :  { %801 = vrsqrt.f32 %v112_v30  ;;  %v113_v34 = vadd.f32 1e-05, %v101_v31 }
  0xad   :  { %v147_v37 = vadd.f32 %v678_v32, %v134_v33 }
  0xae   :  { %v798_v38 = vpop.eup %797  ;;  %803 = vrsqrt.f32 %v113_v34 }
  0xaf   :  { %v152_v39 = vpack.c.bf16 %v147_v37, %v146_v36  ;;  %v122_v40 = vmul.f32 %v798_v38, %v104_v35  ;;  %v175_v35 = vsub.s32 0, %v1076_v2 }
  0xb0   :  { %v800_v41 = vpop.eup %799 }
  0xb1   :  { %296 = vmatmul.mubr.bf16.vlgmr.msra.gmra.mrb[0].mxu0 %v152_v39  ;;  %v123_v42 = vmul.f32 %v800_v41, %v105_v1  ;;  %v135_v43 = vmul.f32 %v677_v23, %v122_v40  ;;  %v382_v1 = vpop.permute.xlu1 %381  ;;  %v176_v40 = vrot.slane %v171_v6, %v175_v35 }
  0xb2   :  { %305 = vmatprep.mubr.bf16.mxu0 %v853_v28 }
  0xb3   :  { %v136_v44 = vmul.f32 %v677_v23, %v123_v42  ;;  %v148_v46 = vadd.f32 %v678_v32, %v135_v43 }
  0xb5   :  { %v149_v47 = vadd.f32 %v678_v32, %v136_v44 }
  0xb6   :  { %v802_v4 = vpop.eup %801 }
  0xb7   :  { %v153_v49 = vpack.c.bf16 %v149_v47, %v148_v46  ;;  %v124_v50 = vmul.f32 %v802_v4, %v106_v45  ;;  %v377_v46 = vpop.permute.xlu0 %376  ;;  %v1089_v47 = vpop.permute.xlu1 %401 }
  0xb8   :  { %v804_v51 = vpop.eup %803 }
  0xb9   :  { %306 = vmatmul.mubr.bf16.gmra.mrb[4].mxu0 %v153_v49  ;;  %v125_v5 = vmul.f32 %v804_v51, %v107_v48  ;;  %v137_v52 = vmul.f32 %v677_v23, %v124_v50 }
  0xba   :  { %315 = vmatprep.mubr.bf16.mxu0 %v853_v28  ;;  %v787_v28 = vld [vmem:[%s1179_s8 + $0x10] sm:$0xff]  }
  0xbb   :  { %v138_v53 = vmul.f32 %v677_v23, %v125_v5  ;;  %v150_v54 = vadd.f32 %v678_v32, %v137_v52  ;;  %733 = vmatpush3.bf16.msra.mxu1 %v787_v28  ;;  %v410_v52 = vld [vmem:[%s1181_s6] sm:$0x7]  ;;  %v387_v28 = vpop.permute.xlu1 %386 }
  0xbc   :  { %734 = vmatprep.subr.bf16.mxu1 %v854_v57  ;;  %v414_v63 = vrot.slane %v410_v52, %v179_v3 }
  0xbd   :  { %v151_v55 = vadd.f32 %v678_v32, %v138_v53 }
  0xbf   :  { %v154_v56 = vpack.c.bf16 %v151_v55, %v150_v54  ;;  %735 = vmatpush3.bf16.msra.mxu1 %v788_v58  ;;  %v1096_v55 = vrot.slane %v410_v52, %v175_v35 }
  0xc0   :  { %736 = vmatprep.subr.bf16.mxu1 %v854_v57 }
  0xc1   :  { %316 = vmatmul.mubr.bf16.gmra.mrb[8].mxu0 %v154_v56 }
  0xc3   :  { %737 = vmatpush3.bf16.msra.mxu1 %v789_v59 }
  0xc4   :  { %738 = vmatprep.subr.bf16.mxu1 %v854_v57 }
  0xc7   :  { %739 = vmatpush3.bf16.msra.mxu1 %v790_v60 }
  0xc8   :  { %740 = vmatprep.subr.bf16.mxu1 %v854_v57 }
  0xcb   :  { %741 = vmatpush3.bf16.msra.mxu1 %v791_v61 }
  0xcc   :  { %742 = vmatprep.subr.bf16.mxu1 %v854_v57 }
  0xcf   :  { %743 = vmatpush3.bf16.msra.mxu1 %v792_v62 }
 0x184   :  { %v297_v10 = vpop.f32.mrb[0].mxu0 }
 0x185   :  { %v299_v11 = vpop.f32.mrb[1].mxu0  ;;  %v298_v44 = vadd.f32 %v297_v10, %v176_v40 }
 0x186   :  { %v300_v12 = vadd.f32 %v299_v11, %v180_v7  ;;  %v301_v13 = vpop.f32.mrb[2].mxu0 }
 0x187   :  { %v303_v14 = vpop.f32.mrb[3].mxu0  ;;  %v302_v4 = vadd.f32 %v301_v13, %v176_v40  ;;  %v467_v13 = vsub.s32 2, %v1076_v2 }
 0x188   :  { %v695_v15 = vmul.f32 -1.442695, %v300_v12  ;;  %v304_v16 = vadd.f32 %v303_v14, %v180_v7 }
 0x18a   :  { %805 = vpow2.f32 %v695_v15  ;;  %v696_v17 = vmul.f32 -1.442695, %v304_v16 }
 0x18c   :  { %807 = vpow2.f32 %v696_v17  ;;  %v307_v18 = vpop.f32.mrb[4].mxu0 }
 0x18d   :  { %v309_v19 = vpop.f32.mrb[5].mxu0  ;;  %v308_v8 = vadd.f32 %v307_v18, %v176_v40  ;;  %v392_v18 = vpop.permute.xlu1 %391 }
 0x18e   :  { %v310_v20 = vadd.f32 %v309_v19, %v180_v7  ;;  %v311_v21 = vpop.f32.mrb[6].mxu0 }
 0x18f   :  { %v313_v22 = vpop.f32.mrb[7].mxu0  ;;  %v312_v6 = vadd.f32 %v311_v21, %v176_v40 }
 0x190   :  { %v697_v23 = vmul.f32 -1.442695, %v310_v20  ;;  %v314_v24 = vadd.f32 %v313_v22, %v180_v7  ;;  %v468_v22 = vrot.slane %v410_v52, %v467_v13 }
 0x192   :  { %809 = vpow2.f32 %v697_v23  ;;  %v698_v25 = vmul.f32 -1.442695, %v314_v24 }
 0x194   :  { %v806_v0 = vpop.eup %805  ;;  %811 = vpow2.f32 %v698_v25  ;;  %v1084_v26 = vpop.f32.mrb[8].mxu0 }
 0x195   :  { %v344_v27 = vadd.f32 1.0, %v806_v0  ;;  %v319_v29 = vpop.f32.mrb[9].mxu0  ;;  %v318_v23 = vadd.f32 %v1084_v26, %v176_v40 }
 0x196   :  { %v808_v30 = vpop.eup %807  ;;  %v320_v31 = vadd.f32 %v319_v29, %v180_v7  ;;  %v1086_v32 = vpop.f32.mrb[10].mxu0 }
 0x197   :  { %813 = vrcp.f32 %v344_v27  ;;  %v345_v33 = vadd.f32 1.0, %v808_v30  ;;  %v323_v34 = vpop.f32.mrb[11].mxu0 }
 0x198   :  { %v699_v36 = vmul.f32 -1.442695, %v320_v31  ;;  %v324_v37 = vadd.f32 %v323_v34, %v180_v7  ;;  %v322_v34 = vadd.f32 %v1086_v32, %v176_v40 }
 0x199   :  { %815 = vrcp.f32 %v345_v33 }
 0x19a   :  { %817 = vpow2.f32 %v699_v36  ;;  %v700_v38 = vmul.f32 -1.442695, %v324_v37  ;;  %v701_v37 = vld [vmem:[%s1182_s7] ss:$0 sm:$0xff] }
 0x19c   :  { %v810_v39 = vpop.eup %809  ;;  %819 = vpow2.f32 %v700_v38 }
 0x19d   :  { %v346_v41 = vadd.f32 1.0, %v810_v39 }
 0x19e   :  { %v812_v42 = vpop.eup %811 }
 0x19f   :  { %821 = vrcp.f32 %v346_v41  ;;  %v347_v43 = vadd.f32 1.0, %v812_v42  ;;  %v397_v42 = vpop.permute.xlu1 %396 }
 0x1a1   :  { %v814_v45 = vpop.eup %813  ;;  %823 = vrcp.f32 %v347_v43 }
 0x1a2   :  { %v362_v48 = vmul.f32 %v814_v45, %v298_v44 }
 0x1a3   :  { %v816_v49 = vpop.eup %815 }
 0x1a4   :  { %v818_v50 = vpop.eup %817  ;;  %v363_v51 = vmul.f32 %v816_v49, %v302_v4  ;;  %v1091_v5 = vmul.f32 %v377_v46, %v362_v48 }
 0x1a5   :  { %v348_v53 = vadd.f32 1.0, %v818_v50 }
 0x1a6   :  { %v820_v54 = vpop.eup %819  ;;  %v405_v56 = vmul.f32 %v382_v1, %v363_v51  ;;  %v421_v60 = vrot.slane %v1091_v5, 7  ;;  %v452_v61 = vrot.slane %v1091_v5, 1  ;;  %v415_v50 = vmul.f32 %v414_v63, %v1091_v5 }
 0x1a7   :  { %825 = vrcp.f32 %v348_v53  ;;  %v349_v9 = vadd.f32 1.0, %v820_v54 }
 0x1a8   :  { %v422_v58 = vrot.slane %v405_v56, 7  ;;  %v453_v59 = vrot.slane %v405_v56, 1  ;;  %v416_v14 = vmul.f32 %v414_v63, %v405_v56 }
 0x1a9   :  { %v822_v62 = vpop.eup %821  ;;  %827 = vrcp.f32 %v349_v9 }
 0x1aa   :  { %v434_v7 = vsel %vm429_vm1, %v421_v60, %v422_v58  ;;  %v1108_v10 = vsel %vm458_vm2, %v452_v61, %v453_v59  ;;  %v364_v11 = vmul.f32 %v822_v62, %v308_v8 }
 0x1ab   :  { %v824_v12 = vpop.eup %823  ;;  %v441_v15 = vmul.f32 %v1096_v55, %v434_v7 }
 0x1ac   :  { %v406_v16 = vmul.f32 %v387_v28, %v364_v11  ;;  %v365_v17 = vmul.f32 %v824_v12, %v312_v6 }
 0x1ad   :  { %v447_v3 = vadd.f32 %v441_v15, %v416_v14 }
 0x1ae   :  { %v423_v19 = vrot.slane %v406_v16, 7  ;;  %v454_v20 = vrot.slane %v406_v16, 1  ;;  %v407_v21 = vmul.f32 %v392_v18, %v365_v17  ;;  %v417_v29 = vmul.f32 %v414_v63, %v406_v16 }
 0x1b0   :  { %v433_v24 = vsel %vm429_vm1, %v422_v58, %v423_v19  ;;  %v462_v25 = vsel %vm458_vm2, %v453_v59, %v454_v20  ;;  %v424_v0 = vrot.slane %v407_v21, 7  ;;  %v455_v33 = vrot.slane %v407_v21, 1 }
 0x1b1   :  { %v826_v27 = vpop.eup %825  ;;  %v442_v30 = vmul.f32 %v1096_v55, %v433_v24  ;;  %v470_v31 = vmul.f32 %v468_v22, %v462_v25  ;;  %v418_v35 = vmul.f32 %v414_v63, %v407_v21 }
 0x1b2   :  { %v432_v36 = vsel %vm429_vm1, %v423_v19, %v424_v0  ;;  %v366_v26 = vmul.f32 %v826_v27, %v318_v23  ;;  %v461_v41 = vsel %vm458_vm2, %v454_v20, %v455_v33 }
 0x1b3   :  { %v828_v38 = vpop.eup %827  ;;  %v448_v1 = vadd.f32 %v442_v30, %v417_v29  ;;  %v443_v39 = vmul.f32 %v1096_v55, %v432_v36  ;;  %v476_v43 = vadd.f32 %v470_v31, %v447_v3  ;;  %v471_v32 = vmul.f32 %v468_v22, %v461_v41 }
 0x1b4   :  { %v367_v44 = vmul.f32 %v828_v38, %v322_v34  ;;  %v408_v40 = vmul.f32 %v397_v42, %v366_v26 }
 0x1b5   :  { %v449_v45 = vadd.f32 %v443_v39, %v418_v35  ;;  %v1127_v46 = vadd.f32 %v701_v37, %v476_v43  ;;  %v477_v51 = vadd.f32 %v471_v32, %v448_v1 }
 0x1b6   :  { %v409_v4 = vmul.f32 %v1089_v47, %v367_v44  ;;  %v425_v48 = vrot.slane %v408_v40, 7  ;;  %v456_v49 = vrot.slane %v408_v40, 1  ;;  %v419_v54 = vmul.f32 %v414_v63, %v408_v40 }
 0x1b7   :  { %v703_v28 = vmul.f32 -1.442695, %v1127_v46  ;;  %v490_v58 = vadd.f32 %v701_v37, %v477_v51 }
 0x1b8   :  { %v426_v52 = vrot.slane %v409_v4, 7  ;;  %v457_v53 = vrot.slane %v409_v4, 1  ;;  %v431_v56 = vsel %vm429_vm1, %v424_v0, %v425_v48  ;;  %v460_v9 = vsel %vm458_vm2, %v455_v33, %v456_v49 }
 0x1b9   :  { %v444_v8 = vmul.f32 %v1096_v55, %v431_v56  ;;  %v420_v6 = vmul.f32 %v414_v63, %v409_v4  ;;  %v472_v13 = vmul.f32 %v468_v22, %v460_v9  ;;  %v704_v15 = vmul.f32 -1.442695, %v490_v58 }
 0x1ba   :  { %v435_v47 = vsel %vm429_vm1, %v426_v52, %v421_v60  ;;  %v464_v5 = vsel %vm458_vm2, %v457_v53, %v452_v61  ;;  %v430_v59 = vsel %vm429_vm1, %v425_v48, %v426_v52  ;;  %v459_v62 = vsel %vm458_vm2, %v456_v49, %v457_v53 }
 0x1bb   :  { %v440_v7 = vmul.f32 %v1096_v55, %v435_v47  ;;  %v445_v11 = vmul.f32 %v1096_v55, %v430_v59  ;;  %v450_v12 = vadd.f32 %v444_v8, %v419_v54  ;;  %v473_v14 = vmul.f32 %v468_v22, %v459_v62 }
 0x1bc   :  { %v469_v60 = vmul.f32 %v468_v22, %v1108_v10  ;;  %v474_v16 = vmul.f32 %v468_v22, %v464_v5  ;;  %v478_v3 = vadd.f32 %v472_v13, %v449_v45  ;;  %829 = vpow2.f32 %v704_v15 }
 0x1bd   :  { %v446_v17 = vadd.f32 %v440_v7, %v415_v50  ;;  %v451_v61 = vadd.f32 %v445_v11, %v420_v6  ;;  %v479_v18 = vadd.f32 %v473_v14, %v450_v12  ;;  %831 = vpow2.f32 %v703_v28 }
 0x1be   :  { %v491_v63 = vadd.f32 %v701_v37, %v478_v3 }
 0x1bf   :  { %v475_v19 = vadd.f32 %v469_v60, %v446_v17  ;;  %v480_v2 = vadd.f32 %v474_v16, %v451_v61  ;;  %v492_v20 = vadd.f32 %v701_v37, %v479_v18 }
 0x1c0   :  { %v705_v55 = vmul.f32 -1.442695, %v491_v63 }
 0x1c1   :  { %v488_v21 = vadd.f32 %v701_v37, %v475_v19  ;;  %v493_v23 = vadd.f32 %v701_v37, %v480_v2  ;;  %v706_v25 = vmul.f32 -1.442695, %v492_v20 }
 0x1c2   :  { %833 = vpow2.f32 %v705_v55 }
 0x1c3   :  { %v702_v24 = vmul.f32 -1.442695, %v488_v21  ;;  %v707_v0 = vmul.f32 -1.442695, %v493_v23 }
 0x1c5   :  { %835 = vpow2.f32 %v702_v24 }
 0x1c6   :  { %837 = vpow2.f32 %v706_v25  ;;  %v830_v10 = vpop.eup %829 }
 0x1c7   :  { %839 = vpow2.f32 %v707_v0  ;;  %v832_v22 = vpop.eup %831  ;;  %v514_v27 = vadd.f32 1.0, %v830_v10 }
 0x1c8   :  { %v513_v29 = vadd.f32 1.0, %v832_v22 }
 0x1c9   :  { %841 = vrcp.f32 %v514_v27 }
 0x1ca   :  { %843 = vrcp.f32 %v513_v29 }
 0x1cc   :  { %v834_v30 = vpop.eup %833 }
 0x1cd   :  { %v515_v33 = vadd.f32 1.0, %v834_v30 }
 0x1cf   :  { %v836_v31 = vpop.eup %835  ;;  %845 = vrcp.f32 %v515_v33 }
 0x1d0   :  { %v512_v34 = vadd.f32 1.0, %v836_v31  ;;  %v838_v35 = vpop.eup %837 }
 0x1d1   :  { %v840_v36 = vpop.eup %839  ;;  %v516_v26 = vadd.f32 1.0, %v838_v35 }
 0x1d2   :  { %847 = vrcp.f32 %v512_v34  ;;  %v517_v37 = vadd.f32 1.0, %v840_v36 }
 0x1d3   :  { %849 = vrcp.f32 %v516_v26  ;;  %v842_v38 = vpop.eup %841 }
 0x1d4   :  { %851 = vrcp.f32 %v517_v37  ;;  %v844_v1 = vpop.eup %843  ;;  %v532_v42 = vmul.f32 %v842_v38, %v490_v58 }
 0x1d5   :  { %v531_v32 = vmul.f32 %v844_v1, %v1127_v46  ;;  %v708_v46 = vld [vmem:[%s1183_s9] ss:$0 sm:$0xff] }
 0x1d9   :  { %v846_v39 = vpop.eup %845 }
 0x1da   :  { %v533_v43 = vmul.f32 %v846_v39, %v491_v63 }
 0x1dc   :  { %v848_v41 = vpop.eup %847  ;;  %v537_v45 = vpack.c.bf16 %v533_v43, %v532_v42 }
 0x1dd   :  { %v530_v44 = vmul.f32 %v848_v41, %v488_v21  ;;  %v850_v40 = vpop.eup %849 }
 0x1de   :  { %v852_v4 = vpop.eup %851  ;;  %v534_v49 = vmul.f32 %v850_v40, %v492_v20 }
 0x1df   :  { %v536_v48 = vpack.c.bf16 %v531_v32, %v530_v44  ;;  %v535_v50 = vmul.f32 %v852_v4, %v493_v23 }
 0x1e1   :  { %745 = vmatmul.mubr.bf16.vlgmr.msra.gmra.mrb[0].mxu1 %v536_v48  ;;  %v538_v51 = vpack.c.bf16 %v535_v50, %v534_v49 }
 0x1e2   :  { %748 = vmatprep.mubr.msk.bf16.mxu1 %vm855_vm0, %v854_v57 }
 0x1e9   :  { %749 = vmatmul.mubr.bf16.gmra.mrb[4].mxu1 %v537_v45 }
 0x1ea   :  { %752 = vmatprep.mubr.msk.bf16.mxu1 %vm855_vm0, %v854_v57 }
 0x1f1   :  { %753 = vmatmul.mubr.bf16.gmra.mrb[8].mxu1 %v538_v51 }
 0x2b4   :  { %v644_v52 = vpop.f32.mrb[0].mxu1 }
 0x2b5   :  { %v645_v53 = vadd.f32 %v708_v46, %v644_v52  ;;  %v746_v54 = vpop.f32.mrb[1].mxu1 }
 0x2b6   :  { %v647_v56 = vpop.f32.mrb[2].mxu1 }
 0x2b7   :  { %667 = vst [vmem:[%s1184_s10] sm:$0xff] %v645_v53  ;;  %v648_v8 = vadd.f32 %v708_v46, %v647_v56  ;;  %v747_v9 = vpop.f32.mrb[3].mxu1 }
 0x2b9   :  { %668 = vst [vmem:[%s1184_s10 + $0x8] sm:$0xff] %v648_v8 }
 0x2bc   :  { %v652_v57 = vpop.f32.mrb[4].mxu1 }
 0x2bd   :  { %v653_v28 = vadd.f32 %v708_v46, %v652_v57  ;;  %v750_v58 = vpop.f32.mrb[5].mxu1 }
 0x2be   :  { %v655_v47 = vpop.f32.mrb[6].mxu1 }
 0x2bf   :  { %669 = vst [vmem:[%s1184_s10 + $0x10] sm:$0xff] %v653_v28  ;;  %v656_v5 = vadd.f32 %v708_v46, %v655_v47  ;;  %v751_v59 = vpop.f32.mrb[7].mxu1 }
 0x2c1   :  { %670 = vst [vmem:[%s1184_s10 + $0x18] sm:$0xff] %v656_v5 }
 0x2c4   :  { %v660_v62 = vpop.f32.mrb[8].mxu1 }
 0x2c5   :  { %v661_v6 = vadd.f32 %v708_v46, %v660_v62  ;;  %v754_v7 = vpop.f32.mrb[9].mxu1 }
 0x2c6   :  { %v663_v11 = vpop.f32.mrb[10].mxu1 }
 0x2c7   :  { %671 = vst [vmem:[%s1184_s10 + $0x20] sm:$0xff] %v661_v6  ;;  %v664_v12 = vadd.f32 %v708_v46, %v663_v11  ;;  %v755_v13 = vpop.f32.mrb[11].mxu1 }
 0x2c9   :  { %672 = vst [vmem:[%s1184_s10 + $0x28] sm:$0xff] %v664_v12 }

</bundles_post_ra>
